<compile_context>
chip_gen: v6e
topology: v6e:2x2x1
jax: 0.10.0
libtpu: 0.0.40
codegen_flags: <defaults>
</compile_context>

<pallas_src>
import jax
import jax.numpy as jnp
from jax.experimental import pallas as pl
from jax.experimental.pallas import tpu as pltpu

LANE = 128  # vreg lane width: batch elements are packed along lanes


def _reg_model_kernel(ac_ref, x_ref, o_ref):
    """out = a * x + c on one lane-dense (row_tile, 128) batch tile.

    ac_ref: (2,) f32 in SMEM (scalar prefetch): [a, c].
    x_ref / o_ref: (row_tile, LANE) f32 tiles, batch mapped onto lanes.
    """
    a = ac_ref[0]
    c = ac_ref[1]
    o_ref[...] = x_ref[...] * a + c


def _round_up(n, m):
    return ((n + m - 1) // m) * m


def _fold_params(params):
    """Fold linear3(linear2(linear1(x))) into scalars [a, c].

    Exact (up to f32 reassociation): the network has no activations, so
        y = x @ W1^T @ W2^T @ W3^T + ((b1 @ W2^T + b2) @ W3^T + b3).
    """
    w1 = params["w1"].astype(jnp.float32)                  # (H, in)
    b1 = params["b1"].reshape(1, -1).astype(jnp.float32)   # (1, H)
    w2 = params["w2"].astype(jnp.float32)                  # (H, H)
    b2 = params["b2"].reshape(1, -1).astype(jnp.float32)   # (1, H)
    w3 = params["w3"].astype(jnp.float32)                  # (out, H)
    b3 = params["b3"].reshape(1, -1).astype(jnp.float32)   # (1, out)

    assert w1.shape[1] == 1, "kernel is specialized to input_size == 1"
    assert w3.shape[0] == 1, "kernel is specialized to output_size == 1"

    w_eff = w3 @ w2 @ w1                      # (1, 1)
    b_eff = (b1 @ w2.T + b2) @ w3.T + b3      # (1, 1)
    return jnp.stack([w_eff[0, 0], b_eff[0, 0]])            # (2,) f32 -> SMEM


def _choose_row_tile(rows_needed):
    """Row tile (multiple of 8): ~1 MiB per buffer, >= 2 grid steps when possible."""
    target = 2048                                   # 2048 rows * 128 lanes * 4 B = 1 MiB
    tr = min(target, _round_up(max(rows_needed, 1), 8))
    if rows_needed >= 16 and rows_needed // tr < 2:  # keep both v7x TensorCores busy
        tr = max(8, _round_up(rows_needed, 16) // 2)
    return tr


def reg_model_forward(x, params):
    """x: (B, 1) float array. params: dict of w1,b1,w2,b2,w3,b3 in PyTorch layouts."""
    B, in_size = x.shape
    out_size = params["w3"].shape[0]
    assert in_size == 1 and out_size == 1, "kernel is specialized to 1 -> H -> H -> 1"

    ac = _fold_params(params)

    rows_needed = pl.cdiv(B, LANE)
    tr = _choose_row_tile(rows_needed)
    rows_pad = _round_up(max(rows_needed, 1), tr)
    b_pad = rows_pad * LANE

    # Lane-dense batch layout: (B,) -> zero-pad -> (rows_pad, 128).
    x_flat = x.reshape(-1).astype(jnp.float32)
    if b_pad != B:
        x_flat = jnp.pad(x_flat, (0, b_pad - B))
    x2d = x_flat.reshape(rows_pad, LANE)

    cost = pl.CostEstimate(
        flops=2 * b_pad,
        transcendentals=0,
        bytes_accessed=2 * b_pad * 4 + ac.size * 4,
    )

    out2d = pl.pallas_call(
        _reg_model_kernel,
        out_shape=jax.ShapeDtypeStruct((rows_pad, LANE), jnp.float32),
        grid_spec=pltpu.PrefetchScalarGridSpec(
            num_scalar_prefetch=1,                       # ac -> SMEM, first kernel arg
            grid=(rows_pad // tr,),
            in_specs=[pl.BlockSpec((tr, LANE), lambda i, ac_ref: (i, 0))],
            out_specs=pl.BlockSpec((tr, LANE), lambda i, ac_ref: (i, 0)),
        ),
        compiler_params=pltpu.CompilerParams(
            dimension_semantics=("parallel",),           # shard batch rows across TCs
        ),
        cost_estimate=cost,
    )(ac, x2d)

    # Contiguous prefix slice + reshape: no strided lane-0 gather, no second full pass.
    return out2d.reshape(-1)[:B].reshape(B, out_size)


def init_params(key, input_size=1, hidden_size=10, output_size=1):
    """Deterministic PyTorch-like (uniform +/- 1/sqrt(fan_in)) initialization."""
    ks = jax.random.split(key, 6)

    def linear_init(kw, kb, fan_in, fan_out):
        bound = 1.0 / jnp.sqrt(jnp.float32(fan_in))
        w = jax.random.uniform(kw, (fan_out, fan_in), jnp.float32, -bound, bound)
        b = jax.random.uniform(kb, (1, fan_out), jnp.float32, -bound, bound)
        return w, b

    w1, b1 = linear_init(ks[0], ks[1], input_size, hidden_size)
    w2, b2 = linear_init(ks[2], ks[3], hidden_size, hidden_size)
    w3, b3 = linear_init(ks[4], ks[5], hidden_size, output_size)
    return {"w1": w1, "b1": b1, "w2": w2, "b2": b2, "w3": w3, "b3": b3}


if __name__ == "__main__":
    key = jax.random.PRNGKey(0)
    k_params, k_x = jax.random.split(key)

    input_size, hidden_size, output_size = 1, 10, 1
    batch = 8

    params = init_params(k_params, input_size, hidden_size, output_size)
    x = jax.random.normal(k_x, (batch, input_size), jnp.float32)

    out = reg_model_forward(x, params)
    out = jax.block_until_ready(out)

    # Reference: the three sequential linears in plain JAX (same math as PyTorch module).
    ref = x @ params["w1"].T + params["b1"]
    ref = ref @ params["w2"].T + params["b2"]
    ref = ref @ params["w3"].T + params["b3"]
    assert out.shape == (batch, output_size)
    assert jnp.allclose(out, ref, atol=1e-5, rtol=1e-5)

    print("KERNEL_OK")
</pallas_src>

<mosaic_0001>
module attributes {stable_mosaic.version = 11 : i64} {
  func.func @_reg_model_kernel(%arg0: i32, %arg1: memref<2xf32, #tpu.memory_space<smem>>, %arg2: memref<8x128xf32, #tpu.memory_space<vmem>>, %arg3: memref<8x128xf32, #tpu.memory_space<vmem>>) attributes {dimension_semantics = [#tpu.dimension_semantics<parallel>], iteration_bounds = array<i64: 1>, scalar_prefetch = 1 : i64, scratch_operands = 0 : i64, tpu.core_type = #tpu.core_type<tc>, window_params = [{transform_indices = @transform_0, window_bounds = array<i64: 8, 128>}, {transform_indices = @transform_1, window_bounds = array<i64: 8, 128>}]} {
    %c0 = arith.constant 0 : index
    %0 = memref.load %arg1[%c0] : memref<2xf32, #tpu.memory_space<smem>>
    %c1 = arith.constant 1 : index
    %1 = memref.load %arg1[%c1] : memref<2xf32, #tpu.memory_space<smem>>
    %c0_0 = arith.constant 0 : index
    %c0_1 = arith.constant 0 : index
    %2 = vector.load %arg2[%c0_0, %c0_1] : memref<8x128xf32, #tpu.memory_space<vmem>>, vector<8x128xf32>
    %3 = vector.broadcast %0 : f32 to vector<8x128xf32>
    %4 = arith.mulf %2, %3 : vector<8x128xf32>
    %5 = vector.broadcast %1 : f32 to vector<8x128xf32>
    %6 = arith.addf %4, %5 : vector<8x128xf32>
    %c0_2 = arith.constant 0 : index
    %c0_3 = arith.constant 0 : index
    %7 = vector.load %arg3[%c0_2, %c0_3] : memref<8x128xf32, #tpu.memory_space<vmem>>, vector<8x128xf32>
    tpu.vector_store %arg3[%c0_2, %c0_3], %6 {strides = array<i32>} : memref<8x128xf32, #tpu.memory_space<vmem>>, vector<8x128xf32>,
    return
  }
  func.func @transform_0(%arg0: i32, %arg1: memref<2xf32, #tpu.memory_space<smem>>) -> (i32, i32) {
    %c0_i32 = arith.constant 0 : i32
    %c0_i32_0 = arith.constant 0 : i32
    return %arg0, %c0_i32 : i32, i32
  }
  func.func @transform_1(%arg0: i32, %arg1: memref<2xf32, #tpu.memory_space<smem>>) -> (i32, i32) {
    %c0_i32 = arith.constant 0 : i32
    %c0_i32_0 = arith.constant 0 : i32
    return %arg0, %c0_i32 : i32, i32
  }
}

</mosaic_0001>

<bundles_post_ra>
// kernel: tpu_custom_call.1
= control target key start
LH: loop header
LB: loop body
LE: loop exit
PB: predicated region body
PF: predicated region fallthrough
CT: control target
= control target key end

     0   :  { %s107_s9 = smov [#allocation3]   ;;  %s134_s0 = inlined_call_operand.hbm [shape: f32[2], index: 0, kind: input, shape index: {}]   ;;  %s135_s1 = inlined_call_operand.hbm [shape: f32[8,128], index: 1, kind: input, shape index: {}]   ;;  %s136_s2 = inlined_call_operand.hbm [shape: f32[8,128], index: 2, kind: output, shape index: {}]  }
   0x1   :  { %8 = dma.hbm_to_smem %s134_s0, 16, %s107_s9, [#allocation2] }
   0x2   :  { %101 = dma.done.wait [#allocation2], 16 }
   0x3   :  { %102 = vsyncadd [#allocation2], 4294967280 }
   0x4   :  { %10 = sfence }
   0x5   :  { %11 = vsyncpa [#allocation5], 0 }
   0x6   :  { %12 = vsyncpa [#allocation6], 0  ;;  %s108_s12 = smov [#allocation4]  }
   0x7   :  { %s19_s13 = sshll.u32 %s108_s12, 4  ;;  %s20_s13 = int_to_ptr.vmem [resolvable:$true] %s19_s13 }
   0x8   :  { %s69_s14 = scalar_lea.vmem %s20_s13, 128  ;;  %p74_p1 = scmp.lt.s32.totalorder %s20_s13, %s20_s13 }
   0x9   :  { %p70_p0 = scmp.ne.s32.totalorder %s20_s13, %s69_s14  ;;  %p75_p2 = scmp.lt.s32.totalorder %s69_s14, %s69_s14 }
   0xb   :  { %p76_p3 = por %p75_p2, %p74_p1 }
   0xd   :  { %p77_p4 = pnand %p76_p3, %p70_p0 }
   0xf   :  { %80 = shalt.err (!%p77_p4)
}
  0x10   :  { %22 = dma.hbm_to_vmem [thread:$0]  %s135_s1, 128, %s20_s13, [#allocation5]  }
  0x11   :  { %103 = dma.done.wait [#allocation5], 128  }
  0x12   :  { %104 = vsyncadd [#allocation5], 4294967168  ;;  %s26_s0 = sld [smem:[#allocation3]]  ;;  %v28_v0 = vld [vmem:[#allocation4] sm:$0xff]  ;;  %s109_s18 = smov [#allocation7]  }
  0x13   :  { %s49_s17 = sld [smem:[#allocation3 + $0x1]]  ;;  %s40_s19 = sshll.u32 %s109_s18, 4  ;;  %s41_s19 = int_to_ptr.vmem [resolvable:$true] %s40_s19 }
  0x14   :  { %s81_s20 = scalar_lea.vmem %s41_s19, 128  ;;  %p86_p6 = scmp.lt.s32.totalorder %s41_s19, %s41_s19 }
  0x15   :  { %p82_p5 = scmp.ne.s32.totalorder %s41_s19, %s81_s20  ;;  %p87_p7 = scmp.lt.s32.totalorder %s81_s20, %s81_s20 }
  0x17   :  { %p88_p8 = por %p87_p7, %p86_p6 }
  0x18   :  { %v29_v1 = vstv %s26_s0 }
  0x19   :  { %v30_v2 = vmul.f32 %v29_v1, %v28_v0  ;;  %v31_v3 = vstv %s49_s17  ;;  %p89_p9 = pnand %p88_p8, %p82_p5 }
  0x1b   :  { %v32_v4 = vadd.f32 %v31_v3, %v30_v2 }
  0x1d   :  { %33 = vst [vmem:[#allocation7] sm:$0xff] %v32_v4 }
  0x1e   :  { %92 = shalt.err (!%p89_p9)
}
  0x1f   :  { %43 = dma.vmem_to_hbm [thread:$0]  %s41_s19, 128, %s136_s2, [#allocation6]  }
  0x20   :  { %105 = dma.done.wait [#allocation6], 128  }
  0x21   :  { %106 = vsyncadd [#allocation6], 4294967168 }
  0x22   :  { %47 = vsyncpa [#allocation5], 1 }
  0x23   :  { %48 = vsyncpa [#allocation6], 1 }

</bundles_post_ra>
